<compile_context>
chip_gen: v5e
topology: v5e:2x2
jax: 0.10.0
libtpu: 0.0.40
codegen_flags: <defaults>
</compile_context>

<pallas_src>
import functools

import jax
import jax.numpy as jnp
from jax.experimental import pallas as pl
from jax.experimental.pallas import tpu as pltpu


def _round_up(n, m):
    return ((n + m - 1) // m) * m


def _choose_tile_n(n):
    if n <= 128:
        return _round_up(max(n, 1), 8)
    # Lane-dense multiple-of-128 tiles; 512-1024 rows for large N amortize the
    # ~0.35us/step grid overhead, while keeping >= ~4 tiles (2x the v7x core
    # count) so megacore sharding always has work on both TensorCores.
    return max(128, min(1024, _round_up(-(-n // 4), 128)))


def _rvq_kernel(x_ref, cb_ref, esq_ref, xq_ref, idx_ref, loss_ref, *,
                n_valid, use_bf16_distances):
    """One grid step == one tile of N rows; all quantizer layers run inside."""
    tile_n, _ = x_ref.shape
    num_q, num_k, _ = cb_ref.shape
    dist_dtype = jnp.bfloat16 if use_bf16_distances else jnp.float32
    nt_dims = (((1,), (1,)), ((), ()))        # A @ B^T (contract last dims, MXU-native)

    def one_layer(q, r, err_acc):
        cb_q = cb_ref[q]                      # (K, D) codebook, f32 (gather RHS)
        esq_q = esq_ref[q]                    # (1, K) == 0.5 * ||e_k||^2

        # Nearest code: argmin_k (0.5*||e_k||^2 - r.e_k).  The 0.5 is folded into
        # esq in the wrapper (argmin-invariant positive scale), so no (tile_n, K)
        # VPU multiply remains.  Optional bf16 operands cut the f32 multi-pass
        # MXU decomposition ~3x; the accumulator stays f32.
        cross = jax.lax.dot_general(
            r.astype(dist_dtype), cb_q.astype(dist_dtype), nt_dims,
            preferred_element_type=jnp.float32)               # (tile_n, K)
        idx = jnp.argmin(esq_q - cross, axis=-1).astype(jnp.int32)   # (tile_n,)

        # Nearest-code gather via a one-hot f32 MXU matmul (picks out e[idx]).
        lane_ids = jax.lax.broadcasted_iota(jnp.int32, (tile_n, num_k), 1)
        one_hot = (lane_ids == idx[:, None]).astype(jnp.float32)     # (tile_n, K)
        xr = jnp.dot(one_hot, cb_q, preferred_element_type=jnp.float32)  # (tile_n, D)

        # Layer-major index rows: one lane-dense store per layer.
        idx_ref[q, :] = idx

        # Residual update doubles as the quantization error: (xr - r) == -r_new.
        r_new = r - xr
        return r_new, err_acc + r_new * r_new

    r0 = x_ref[...]                           # (tile_n, D) f32 initial residual
    err0 = jnp.zeros_like(r0)                 # (tile_n, D) squared-error accumulator
    if num_q <= 4:
        # Small stacks: static unroll (max LLO scheduling visibility).
        r, err_acc = r0, err0
        for q in range(num_q):
            r, err_acc = one_layer(q, r, err_acc)
    else:
        # Deep RVQ stacks: fori_loop bounds live ranges / code size.
        def body(q, carry):
            return one_layer(q, *carry)
        r, err_acc = jax.lax.fori_loop(0, num_q, body, (r0, err0), unroll=True)

    # x_q == x - final residual; re-read x_ref so x need not stay vreg-live
    # across the whole layer loop (drops the old running x_q accumulator).
    xq_ref[...] = x_ref[...] - r

    # Single cross-lane reduce per tile; mask padded rows; one lane-broadcast
    # scalar store instead of an (tile_n, 1) column of masked stores.
    row_ids = (jax.lax.broadcasted_iota(jnp.int32, (tile_n, 1), 0)
               + pl.program_id(0) * tile_n)
    valid = (row_ids < n_valid).astype(jnp.float32)             # (tile_n, 1)
    per_row = jnp.sum(err_acc, axis=-1, keepdims=True)          # (tile_n, 1)
    tile_sum = jnp.sum(per_row * valid, axis=0, keepdims=True)  # (1, 1)
    loss_ref[...] = jnp.broadcast_to(tile_sum[None], (1, 1, 128))
    # TODO(synk): kmeans codebook re-init (kmeans_init / kmeans_iters) is a
    # training-time side effect and is not part of this forward kernel.


def rvq_forward(x, codebooks, beta=0.25, *, use_bf16_distances=False):
    """Runs the full residual VQ stack in a single pallas_call.

    Args:
      x:         (N, D) float32 latent vectors.
      codebooks: (Q, K, D) float32 stacked codebooks (one per quantizer layer).
      use_bf16_distances: bf16 distance matmul (recommended on v6e/v7x); indices
        may differ from the f32 path at near-tied codes.
    Returns:
      x_q:         (N, D) float32 quantized reconstruction.
      mean_loss:   () float32 mean of per-layer VQ losses.
      all_indices: (N, Q) int32 selected code indices per layer.
    """
    N, D = x.shape
    Q, K, _ = codebooks.shape

    x = x.astype(jnp.float32)
    codebooks = codebooks.astype(jnp.float32)

    tile_n = _choose_tile_n(N)
    n_pad = _round_up(N, tile_n)
    num_tiles = n_pad // tile_n
    x_in = x if n_pad == N else jnp.zeros((n_pad, D), jnp.float32).at[:N].set(x)

    # 0.5*||e||^2 precomputed in the wrapper (exact halving; folds the former
    # in-kernel "2*cross" multiply out of the distance expression).
    esq_half = 0.5 * jnp.sum(codebooks * codebooks, axis=-1)[:, None, :]   # (Q, 1, K)

    kernel = functools.partial(
        _rvq_kernel, n_valid=N, use_bf16_distances=use_bf16_distances)

    xq_pad, idx_qn, tile_loss = pl.pallas_call(
        kernel,
        out_shape=(
            jax.ShapeDtypeStruct((n_pad, D), jnp.float32),          # x_q (padded)
            jax.ShapeDtypeStruct((Q, n_pad), jnp.int32),            # indices, layer-major
            jax.ShapeDtypeStruct((num_tiles, 1, 128), jnp.float32),  # per-tile loss sums
        ),
        grid_spec=pltpu.PrefetchScalarGridSpec(
            num_scalar_prefetch=0,
            grid=(num_tiles,),
            in_specs=[
                pl.BlockSpec((tile_n, D), lambda i: (i, 0)),    # x tile
                pl.BlockSpec((Q, K, D), lambda i: (0, 0, 0)),   # codebooks (VMEM-resident)
                pl.BlockSpec((Q, 1, K), lambda i: (0, 0, 0)),   # 0.5*||e||^2 (resident)
            ],
            out_specs=[
                pl.BlockSpec((tile_n, D), lambda i: (i, 0)),    # x_q tile
                pl.BlockSpec((Q, tile_n), lambda i: (0, i)),    # index tile (lane-dense rows)
                pl.BlockSpec((1, 1, 128), lambda i: (i, 0, 0)),  # per-tile loss scalar
            ],
        ),
        compiler_params=pltpu.CompilerParams(
            # N tiles are independent -> megacore-shardable on v7x.
            dimension_semantics=("parallel",),
            vmem_limit_bytes=48 * 1024 * 1024,   # headroom; < v7x 64 MiB VMEM
        ),
    )(x_in, codebooks, esq_half)

    x_q = xq_pad[:N]
    all_indices = idx_qn[:, :N].T                       # (N, Q) == torch.stack(dim=-1)
    mean_loss = (1.0 + beta) * jnp.sum(tile_loss[:, 0, 0]) / (Q * N * D)
    return x_q, mean_loss, all_indices


def rvq_reference(x, codebooks, beta=0.25):
    """Pure-JAX reference mirroring the PyTorch forward (numeric values).

    The per-row ||r||^2 term is omitted from the nearest-code search because it
    is constant per row and does not affect the argmin (mathematically identical
    to the full squared distance the torch module uses).
    """
    residual = x
    x_q = jnp.zeros_like(x)
    losses, indices = [], []
    for q in range(codebooks.shape[0]):
        e = codebooks[q]
        scores = (jnp.sum(e * e, axis=1)[None, :]
                  - 2.0 * jnp.dot(residual, e.T, precision=jax.lax.Precision.HIGHEST))
        idx = jnp.argmin(scores, axis=-1).astype(jnp.int32)
        xr = e[idx]
        losses.append((1.0 + beta) * jnp.mean((xr - residual) ** 2))
        indices.append(idx)
        residual = residual - xr
        x_q = x_q + xr
    return x_q, jnp.stack(losses).mean(), jnp.stack(indices, axis=-1)


if __name__ == "__main__":
    beta = 0.25
    D, Q, K = 32, 3, 64        # e_dim=32, n_e_list=[64, 64, 64]

    # Case 1: small shapes consistent with the module (N=8 latent vectors).
    N = 8
    kx, kc = jax.random.split(jax.random.PRNGKey(0))
    x = jax.random.normal(kx, (N, D), dtype=jnp.float32)
    # nn.Embedding-style deterministic init: uniform(-1/n_e, 1/n_e) per codebook.
    codebooks = jax.random.uniform(
        kc, (Q, K, D), dtype=jnp.float32, minval=-1.0 / K, maxval=1.0 / K)

    x_q, mean_loss, all_indices = jax.block_until_ready(
        rvq_forward(x, codebooks, beta=beta))
    x_q_r, loss_r, idx_r = rvq_reference(x, codebooks, beta=beta)
    assert x_q.shape == (N, D) and all_indices.shape == (N, Q)
    assert jnp.allclose(x_q, x_q_r, atol=1e-5, rtol=1e-5)
    assert jnp.allclose(mean_loss, loss_r, atol=1e-6, rtol=1e-5)
    assert jnp.array_equal(all_indices, idx_r)

    # Case 2: exercises the multi-tile grid, padding and masked-loss path.
    N2 = 300
    kx2, kc2 = jax.random.split(jax.random.PRNGKey(1))
    x2 = jax.random.normal(kx2, (N2, D), dtype=jnp.float32)
    cb2 = jax.random.uniform(
        kc2, (Q, K, D), dtype=jnp.float32, minval=-1.0 / K, maxval=1.0 / K)

    x_q2, loss2, idx2 = jax.block_until_ready(rvq_forward(x2, cb2, beta=beta))
    x_q2_r, loss2_r, idx2_r = rvq_reference(x2, cb2, beta=beta)
    assert jnp.allclose(x_q2, x_q2_r, atol=1e-5, rtol=1e-5)
    assert jnp.allclose(loss2, loss2_r, atol=1e-6, rtol=1e-5)
    assert jnp.array_equal(idx2, idx2_r)

    # Case 3: bf16 distance-matmul fast path (recommended on v6e/v7x bf16-native
    # MXUs).  Indices can legitimately differ from the f32 reference at near-tied
    # codes, so only run and sanity-check it here.
    x_q3, loss3, idx3 = jax.block_until_ready(
        rvq_forward(x2, cb2, beta=beta, use_bf16_distances=True))
    assert x_q3.shape == (N2, D) and idx3.shape == (N2, Q)
    assert bool(jnp.isfinite(loss3))

    print("KERNEL_OK")
</pallas_src>

<mosaic_0001>
module attributes {stable_mosaic.version = 11 : i64} {
  func.func @_rvq_kernel(%arg0: i32, %arg1: memref<8x32xf32, #tpu.memory_space<vmem>>, %arg2: memref<3x64x32xf32, #tpu.memory_space<vmem>>, %arg3: memref<3x1x64xf32, #tpu.memory_space<vmem>>, %arg4: memref<8x32xf32, #tpu.memory_space<vmem>>, %arg5: memref<3x8xi32, #tpu.memory_space<vmem>>, %arg6: memref<1x1x128xf32, #tpu.memory_space<vmem>>) attributes {dimension_semantics = [#tpu.dimension_semantics<parallel>], iteration_bounds = array<i64: 1>, scalar_prefetch = 0 : i64, scratch_operands = 0 : i64, tpu.core_type = #tpu.core_type<tc>, window_params = [{transform_indices = @transform_0, window_bounds = array<i64: 8, 32>}, {pipeline_mode = #tpu.pipeline_mode<synchronous>, transform_indices = @transform_1, window_bounds = array<i64: 3, 64, 32>}, {pipeline_mode = #tpu.pipeline_mode<synchronous>, transform_indices = @transform_2, window_bounds = array<i64: 3, 1, 64>}, {transform_indices = @transform_3, window_bounds = array<i64: 8, 32>}, {transform_indices = @transform_4, window_bounds = array<i64: 3, 8>}, {transform_indices = @transform_5, window_bounds = array<i64: 1, 1, 128>}]} {
    %c0 = arith.constant 0 : index
    %c0_0 = arith.constant 0 : index
    %0 = vector.load %arg1[%c0, %c0_0] : memref<8x32xf32, #tpu.memory_space<vmem>>, vector<8x32xf32>
    %cst = arith.constant 0.000000e+00 : f32
    %1 = vector.broadcast %cst : f32 to vector<8x32xf32>
    %c0_1 = arith.constant 0 : index
    %c0_2 = arith.constant 0 : index
    %c0_3 = arith.constant 0 : index
    %2 = vector.load %arg2[%c0_1, %c0_2, %c0_3] : memref<3x64x32xf32, #tpu.memory_space<vmem>>, vector<1x64x32xf32>
    %3 = vector.shape_cast %2 : vector<1x64x32xf32> to vector<64x32xf32>
    %c0_4 = arith.constant 0 : index
    %c0_5 = arith.constant 0 : index
    %c0_6 = arith.constant 0 : index
    %4 = vector.load %arg3[%c0_4, %c0_5, %c0_6] : memref<3x1x64xf32, #tpu.memory_space<vmem>>, vector<1x1x64xf32>
    %5 = vector.shape_cast %4 : vector<1x1x64xf32> to vector<1x64xf32>
    %cst_7 = arith.constant dense<0.000000e+00> : vector<8x64xf32>
    %6 = tpu.matmul %0, %3, %cst_7 {dimension_numbers = #tpu.dot_dimension_numbers<[1], [1], [0], [0], [0, 0, 1, 0], [], []>} : vector<8x32xf32>, vector<64x32xf32>, vector<8x64xf32> -> vector<8x64xf32>
    %7 = vector.broadcast %5 : vector<1x64xf32> to vector<8x64xf32>
    %8 = arith.subf %7, %6 : vector<8x64xf32>
    %9 = tpu.reduce_index %8 {axis = 1 : i32, kind = #tpu.reduction_kind<arg_min>} : vector<8x64xf32> -> vector<8xi32>
    %10 = tpu.iota {dimensions = array<i32: 1>} : vector<8x64xi32>
    %11 = vector.shape_cast %9 : vector<8xi32> to vector<8x1xi32>
    %12 = vector.broadcast %11 : vector<8x1xi32> to vector<8x64xi32>
    %13 = arith.cmpi eq, %10, %12 : vector<8x64xi32>
    %14 = arith.extui %13 : vector<8x64xi1> to vector<8x64xi32>
    %15 = arith.sitofp %14 : vector<8x64xi32> to vector<8x64xf32>
    %cst_8 = arith.constant dense<0.000000e+00> : vector<8x32xf32>
    %16 = tpu.matmul %15, %3, %cst_8 {dimension_numbers = #tpu.dot_dimension_numbers<[1], [0], [0], [1], [0, 0, 1, 1], [], []>} : vector<8x64xf32>, vector<64x32xf32>, vector<8x32xf32> -> vector<8x32xf32>
    %c0_9 = arith.constant 0 : index
    %c0_10 = arith.constant 0 : index
    %17 = vector.load %arg5[%c0_9, %c0_10] : memref<3x8xi32, #tpu.memory_space<vmem>>, vector<1x8xi32>
    %18 = vector.shape_cast %17 : vector<1x8xi32> to vector<8xi32>
    %19 = vector.shape_cast %9 : vector<8xi32> to vector<1x8xi32>
    tpu.vector_store %arg5[%c0_9, %c0_10], %19 {strides = array<i32>} : memref<3x8xi32, #tpu.memory_space<vmem>>, vector<1x8xi32>,
    %20 = arith.subf %0, %16 : vector<8x32xf32>
    %21 = arith.mulf %20, %20 : vector<8x32xf32>
    %22 = arith.addf %1, %21 : vector<8x32xf32>
    %c1 = arith.constant 1 : index
    %c0_11 = arith.constant 0 : index
    %c0_12 = arith.constant 0 : index
    %23 = vector.load %arg2[%c1, %c0_11, %c0_12] : memref<3x64x32xf32, #tpu.memory_space<vmem>>, vector<1x64x32xf32>
    %24 = vector.shape_cast %23 : vector<1x64x32xf32> to vector<64x32xf32>
    %c1_13 = arith.constant 1 : index
    %c0_14 = arith.constant 0 : index
    %c0_15 = arith.constant 0 : index
    %25 = vector.load %arg3[%c1_13, %c0_14, %c0_15] : memref<3x1x64xf32, #tpu.memory_space<vmem>>, vector<1x1x64xf32>
    %26 = vector.shape_cast %25 : vector<1x1x64xf32> to vector<1x64xf32>
    %cst_16 = arith.constant dense<0.000000e+00> : vector<8x64xf32>
    %27 = tpu.matmul %20, %24, %cst_16 {dimension_numbers = #tpu.dot_dimension_numbers<[1], [1], [0], [0], [0, 0, 1, 0], [], []>} : vector<8x32xf32>, vector<64x32xf32>, vector<8x64xf32> -> vector<8x64xf32>
    %28 = vector.broadcast %26 : vector<1x64xf32> to vector<8x64xf32>
    %29 = arith.subf %28, %27 : vector<8x64xf32>
    %30 = tpu.reduce_index %29 {axis = 1 : i32, kind = #tpu.reduction_kind<arg_min>} : vector<8x64xf32> -> vector<8xi32>
    %31 = tpu.iota {dimensions = array<i32: 1>} : vector<8x64xi32>
    %32 = vector.shape_cast %30 : vector<8xi32> to vector<8x1xi32>
    %33 = vector.broadcast %32 : vector<8x1xi32> to vector<8x64xi32>
    %34 = arith.cmpi eq, %31, %33 : vector<8x64xi32>
    %35 = arith.extui %34 : vector<8x64xi1> to vector<8x64xi32>
    %36 = arith.sitofp %35 : vector<8x64xi32> to vector<8x64xf32>
    %cst_17 = arith.constant dense<0.000000e+00> : vector<8x32xf32>
    %37 = tpu.matmul %36, %24, %cst_17 {dimension_numbers = #tpu.dot_dimension_numbers<[1], [0], [0], [1], [0, 0, 1, 1], [], []>} : vector<8x64xf32>, vector<64x32xf32>, vector<8x32xf32> -> vector<8x32xf32>
    %c1_18 = arith.constant 1 : index
    %c0_19 = arith.constant 0 : index
    %38 = vector.load %arg5[%c1_18, %c0_19] : memref<3x8xi32, #tpu.memory_space<vmem>>, vector<1x8xi32>
    %39 = vector.shape_cast %38 : vector<1x8xi32> to vector<8xi32>
    %40 = vector.shape_cast %30 : vector<8xi32> to vector<1x8xi32>
    tpu.vector_store %arg5[%c1_18, %c0_19], %40 {strides = array<i32>} : memref<3x8xi32, #tpu.memory_space<vmem>>, vector<1x8xi32>,
    %41 = arith.subf %20, %37 : vector<8x32xf32>
    %42 = arith.mulf %41, %41 : vector<8x32xf32>
    %43 = arith.addf %22, %42 : vector<8x32xf32>
    %c2 = arith.constant 2 : index
    %c0_20 = arith.constant 0 : index
    %c0_21 = arith.constant 0 : index
    %44 = vector.load %arg2[%c2, %c0_20, %c0_21] : memref<3x64x32xf32, #tpu.memory_space<vmem>>, vector<1x64x32xf32>
    %45 = vector.shape_cast %44 : vector<1x64x32xf32> to vector<64x32xf32>
    %c2_22 = arith.constant 2 : index
    %c0_23 = arith.constant 0 : index
    %c0_24 = arith.constant 0 : index
    %46 = vector.load %arg3[%c2_22, %c0_23, %c0_24] : memref<3x1x64xf32, #tpu.memory_space<vmem>>, vector<1x1x64xf32>
    %47 = vector.shape_cast %46 : vector<1x1x64xf32> to vector<1x64xf32>
    %cst_25 = arith.constant dense<0.000000e+00> : vector<8x64xf32>
    %48 = tpu.matmul %41, %45, %cst_25 {dimension_numbers = #tpu.dot_dimension_numbers<[1], [1], [0], [0], [0, 0, 1, 0], [], []>} : vector<8x32xf32>, vector<64x32xf32>, vector<8x64xf32> -> vector<8x64xf32>
    %49 = vector.broadcast %47 : vector<1x64xf32> to vector<8x64xf32>
    %50 = arith.subf %49, %48 : vector<8x64xf32>
    %51 = tpu.reduce_index %50 {axis = 1 : i32, kind = #tpu.reduction_kind<arg_min>} : vector<8x64xf32> -> vector<8xi32>
    %52 = tpu.iota {dimensions = array<i32: 1>} : vector<8x64xi32>
    %53 = vector.shape_cast %51 : vector<8xi32> to vector<8x1xi32>
    %54 = vector.broadcast %53 : vector<8x1xi32> to vector<8x64xi32>
    %55 = arith.cmpi eq, %52, %54 : vector<8x64xi32>
    %56 = arith.extui %55 : vector<8x64xi1> to vector<8x64xi32>
    %57 = arith.sitofp %56 : vector<8x64xi32> to vector<8x64xf32>
    %cst_26 = arith.constant dense<0.000000e+00> : vector<8x32xf32>
    %58 = tpu.matmul %57, %45, %cst_26 {dimension_numbers = #tpu.dot_dimension_numbers<[1], [0], [0], [1], [0, 0, 1, 1], [], []>} : vector<8x64xf32>, vector<64x32xf32>, vector<8x32xf32> -> vector<8x32xf32>
    %c2_27 = arith.constant 2 : index
    %c0_28 = arith.constant 0 : index
    %59 = vector.load %arg5[%c2_27, %c0_28] : memref<3x8xi32, #tpu.memory_space<vmem>>, vector<1x8xi32>
    %60 = vector.shape_cast %59 : vector<1x8xi32> to vector<8xi32>
    %61 = vector.shape_cast %51 : vector<8xi32> to vector<1x8xi32>
    tpu.vector_store %arg5[%c2_27, %c0_28], %61 {strides = array<i32>} : memref<3x8xi32, #tpu.memory_space<vmem>>, vector<1x8xi32>,
    %62 = arith.subf %41, %58 : vector<8x32xf32>
    %63 = arith.mulf %62, %62 : vector<8x32xf32>
    %64 = arith.addf %43, %63 : vector<8x32xf32>
    %c0_29 = arith.constant 0 : index
    %c0_30 = arith.constant 0 : index
    %65 = vector.load %arg1[%c0_29, %c0_30] : memref<8x32xf32, #tpu.memory_space<vmem>>, vector<8x32xf32>
    %66 = arith.subf %65, %62 : vector<8x32xf32>
    %c0_31 = arith.constant 0 : index
    %c0_32 = arith.constant 0 : index
    %67 = vector.load %arg4[%c0_31, %c0_32] : memref<8x32xf32, #tpu.memory_space<vmem>>, vector<8x32xf32>
    tpu.vector_store %arg4[%c0_31, %c0_32], %66 {strides = array<i32>} : memref<8x32xf32, #tpu.memory_space<vmem>>, vector<8x32xf32>,
    %68 = tpu.iota {dimensions = array<i32: 0>} : vector<8x1xi32>
    %c8_i32 = arith.constant 8 : i32
    %69 = arith.muli %arg0, %c8_i32 : i32
    %70 = vector.broadcast %69 : i32 to vector<8x1xi32>
    %71 = arith.addi %68, %70 : vector<8x1xi32>
    %c8_i32_33 = arith.constant 8 : i32
    %72 = vector.broadcast %c8_i32_33 : i32 to vector<8x1xi32>
    %73 = arith.cmpi slt, %71, %72 : vector<8x1xi32>
    %74 = arith.extui %73 : vector<8x1xi1> to vector<8x1xi32>
    %75 = arith.sitofp %74 : vector<8x1xi32> to vector<8x1xf32>
    %cst_34 = arith.constant dense<0.000000e+00> : vector<8xf32>
    %76 = vector.multi_reduction <add>, %64, %cst_34 [1] : vector<8x32xf32> to vector<8xf32>
    %77 = vector.shape_cast %76 : vector<8xf32> to vector<8x1xf32>
    %78 = arith.mulf %77, %75 : vector<8x1xf32>
    %cst_35 = arith.constant dense<0.000000e+00> : vector<1xf32>
    %79 = vector.multi_reduction <add>, %78, %cst_35 [0] : vector<8x1xf32> to vector<1xf32>
    %80 = vector.shape_cast %79 : vector<1xf32> to vector<1x1xf32>
    %81 = vector.shape_cast %80 : vector<1x1xf32> to vector<1x1x1xf32>
    %82 = vector.shape_cast %81 : vector<1x1x1xf32> to vector<1x1x1xf32>
    %83 = vector.broadcast %82 : vector<1x1x1xf32> to vector<1x1x128xf32>
    %c0_36 = arith.constant 0 : index
    %c0_37 = arith.constant 0 : index
    %c0_38 = arith.constant 0 : index
    %84 = vector.load %arg6[%c0_36, %c0_37, %c0_38] : memref<1x1x128xf32, #tpu.memory_space<vmem>>, vector<1x1x128xf32>
    tpu.vector_store %arg6[%c0_36, %c0_37, %c0_38], %83 {strides = array<i32>} : memref<1x1x128xf32, #tpu.memory_space<vmem>>, vector<1x1x128xf32>,
    return
  }
  func.func @transform_0(%arg0: i32) -> (i32, i32) {
    %c0_i32 = arith.constant 0 : i32
    %c0_i32_0 = arith.constant 0 : i32
    return %arg0, %c0_i32 : i32, i32
  }
  func.func @transform_1(%arg0: i32) -> (i32, i32, i32) {
    %c0_i32 = arith.constant 0 : i32
    %c0_i32_0 = arith.constant 0 : i32
    %c0_i32_1 = arith.constant 0 : i32
    %c0_i32_2 = arith.constant 0 : i32
    return %c0_i32, %c0_i32_0, %c0_i32_1 : i32, i32, i32
  }
  func.func @transform_2(%arg0: i32) -> (i32, i32, i32) {
    %c0_i32 = arith.constant 0 : i32
    %c0_i32_0 = arith.constant 0 : i32
    %c0_i32_1 = arith.constant 0 : i32
    %c0_i32_2 = arith.constant 0 : i32
    return %c0_i32, %c0_i32_0, %c0_i32_1 : i32, i32, i32
  }
  func.func @transform_3(%arg0: i32) -> (i32, i32) {
    %c0_i32 = arith.constant 0 : i32
    %c0_i32_0 = arith.constant 0 : i32
    return %arg0, %c0_i32 : i32, i32
  }
  func.func @transform_4(%arg0: i32) -> (i32, i32) {
    %c0_i32 = arith.constant 0 : i32
    %c0_i32_0 = arith.constant 0 : i32
    return %c0_i32, %arg0 : i32, i32
  }
  func.func @transform_5(%arg0: i32) -> (i32, i32, i32) {
    %c0_i32 = arith.constant 0 : i32
    %c0_i32_0 = arith.constant 0 : i32
    %c0_i32_1 = arith.constant 0 : i32
    return %arg0, %c0_i32, %c0_i32_0 : i32, i32, i32
  }
}

</mosaic_0001>

<bundles_post_ra>
// kernel: tpu_custom_call.1
= control target key start
LH: loop header
LB: loop body
LE: loop exit
PB: predicated region body
PF: predicated region fallthrough
CT: control target
= control target key end

     0   :  { %11 = vsyncpa [#allocation3], 0  ;;  %vm29_vm0 = vcmask 261120   ;;  %s692_s0 = inlined_call_operand.vmem [shape: f32[8,32], index: 0, kind: input, shape index: {}]   ;;  %s693_s1 = inlined_call_operand.vmem [shape: f32[3,64,32], index: 1, kind: input, shape index: {}]   ;;  %s694_s2 = inlined_call_operand.vmem [shape: f32[3,1,64], index: 2, kind: input, shape index: {}]   ;;  %s695_s3 = inlined_call_operand.hbm [shape: f32[8,32], index: 3, kind: output, shape index: {0}]   ;;  %s696_s4 = inlined_call_operand.hbm [shape: s32[3,8], index: 4, kind: output, shape index: {1}]   ;;  %s697_s5 = inlined_call_operand.hbm [shape: f32[1,1,128], index: 5, kind: output, shape index: {2}]  }
   0x1   :  { %v27_v0 = vld [vmem:[%s693_s1 + $0x38] sm:$0xff]  ;;  %v26_v1 = vld [vmem:[%s693_s1 + $0x30] sm:$0xff]  ;;  %v25_v2 = vld [vmem:[%s693_s1 + $0x28] sm:$0xff] }
   0x2   :  { %380 = vmatpush.xpose.msk.msra.mxu0 %vm29_vm0, %v27_v0  ;;  %101 = vmatpush.msra.mxu1 %v27_v0 }
   0x4   :  { %102 = vmatpush.msra.mxu1 %v26_v1 }
   0x5   :  { %12 = vsyncpa [#allocation5], 0  ;;  %v24_v3 = vld [vmem:[%s693_s1 + $0x20] sm:$0xff]  ;;  %v23_v4 = vld [vmem:[%s693_s1 + $0x18] sm:$0xff]  ;;  %vm81_vm1 = vcmask 523264   ;;  %v85_v20 = vlaneseq  ;;  %vm114_vm2 = vcmask 57344  }
   0x6   :  { %381 = vmatpush.xpose.msk.msra.mxu0 %vm29_vm0, %v26_v1  ;;  %103 = vmatpush.msra.mxu1 %v25_v2  ;;  %v22_v5 = vld [vmem:[%s693_s1 + $0x10] sm:$0xff]  ;;  %v21_v6 = vld [vmem:[%s693_s1 + $0x8] sm:$0xff]  ;;  %v20_v7 = vld [vmem:[%s693_s1] sm:$0xff]  ;;  %v514_v24 = vmov 0.0   ;;  %s351_s22 = sshll.u32 %s696_s4, 4  ;;  %s515_s23 = smov [#allocation4]   ;;  %s352_s22 = int_to_ptr.hbm [resolvable:$true] %s351_s22 }
   0x7   :  { %v583_v8 = vld [vmem:[%s692_s0] sm:$0xff]  ;;  %v398_v13 = vld [vmem:[%s693_s1 + $0x78] sm:$0xff]  ;;  %v397_v14 = vld [vmem:[%s693_s1 + $0x70] sm:$0xff]  ;;  %v619_v21 = vand.u32 127, %v85_v20  ;;  %s349_s24 = sshll.u32 %s515_s23, 4  ;;  %s516_s25 = smov [#allocation2]   ;;  %s350_s24 = int_to_ptr.vmem [resolvable:$true] %s349_s24 }
   0x8   :  { %104 = vmatpush.msra.mxu1 %v24_v3  ;;  %v435_v9 = vld [vmem:[%s694_s2] ss:$0 sm:$0xff]  ;;  %400 = vmatpush.xpose.msk.msra.mxu2 %vm29_vm0, %v398_v13  ;;  %v396_v15 = vld [vmem:[%s693_s1 + $0x68] sm:$0xff]  ;;  %v394_v17 = vld [vmem:[%s693_s1 + $0x58] sm:$0xff]  ;;  %s338_s26 = sshll.u32 %s516_s25, 4  ;;  %s340_s29 = sshll.u32 %s695_s3, 4  ;;  %s339_s26 = int_to_ptr.vmem [resolvable:$true] %s338_s26  ;;  %s341_s29 = int_to_ptr.hbm [resolvable:$true] %s340_s29 }
   0x9   :  { %198 = vmatpush.msra.mxu3 %v398_v13  ;;  %v395_v16 = vld [vmem:[%s693_s1 + $0x60] sm:$0xff]  ;;  %v393_v18 = vld [vmem:[%s693_s1 + $0x50] sm:$0xff]  ;;  %v392_v19 = vld [vmem:[%s693_s1 + $0x48] sm:$0xff]  ;;  %s517_s4 = smov [#allocation6]   ;;  %s362_s8 = sshll.u32 %s697_s5, 4  ;;  %s363_s8 = int_to_ptr.hbm [resolvable:$true] %s362_s8 }
   0xa   :  { %382 = vmatpush.xpose.msk.msra.mxu0 %vm29_vm0, %v25_v2  ;;  %105 = vmatpush.msra.mxu1 %v23_v4  ;;  %v391_v26 = vld [vmem:[%s693_s1 + $0x40] sm:$0xff]  ;;  %v418_v33 = vld [vmem:[%s693_s1 + $0xb8] sm:$0xff]  ;;  %v417_v34 = vld [vmem:[%s693_s1 + $0xb0] sm:$0xff]  ;;  %s360_s30 = sshll.u32 %s517_s4, 4  ;;  %s361_s30 = int_to_ptr.vmem [resolvable:$true] %s360_s30 }
   0xb   :  { %199 = vmatpush.msra.mxu3 %v397_v14  ;;  %v436_v29 = vld [vmem:[%s694_s2 + $0x1] ss:$0 sm:$0xff]  ;;  %v416_v35 = vld [vmem:[%s693_s1 + $0xa8] sm:$0xff]  ;;  %v414_v37 = vld [vmem:[%s693_s1 + $0x98] sm:$0xff] }
   0xc   :  { %106 = vmatpush.msra.mxu1 %v22_v5  ;;  %401 = vmatpush.xpose.msk.msra.mxu2 %vm29_vm0, %v397_v14  ;;  %v415_v36 = vld [vmem:[%s693_s1 + $0xa0] sm:$0xff]  ;;  %v413_v38 = vld [vmem:[%s693_s1 + $0x90] sm:$0xff]  ;;  %v412_v39 = vld [vmem:[%s693_s1 + $0x88] sm:$0xff] }
   0xd   :  { %200 = vmatpush.msra.mxu3 %v396_v15  ;;  %v411_v43 = vld [vmem:[%s693_s1 + $0x80] sm:$0xff] }
   0xe   :  { %383 = vmatpush.xpose.msk.msra.mxu0 %vm29_vm0, %v24_v3  ;;  %107 = vmatpush.msra.mxu1 %v21_v6  ;;  %v437_v46 = vld [vmem:[%s694_s2 + $0x2] ss:$0 sm:$0xff] }
   0xf   :  { %201 = vmatpush.msra.mxu3 %v395_v16 }
  0x10   :  { %108 = vmatpush.msra.mxu1 %v20_v7  ;;  %402 = vmatpush.xpose.msk.msra.mxu2 %vm29_vm0, %v396_v15 }
  0x11   :  { %202 = vmatpush.msra.mxu3 %v394_v17 }
  0x12   :  { %384 = vmatpush.xpose.msk.msra.mxu0 %vm29_vm0, %v23_v4  ;;  %420 = vmatpush.xpose.msk.msrb.mxu1 %vm29_vm0, %v418_v33 }
  0x13   :  { %203 = vmatpush.msra.mxu3 %v393_v18 }
  0x14   :  { %403 = vmatpush.xpose.msk.msra.mxu2 %vm29_vm0, %v395_v16 }
  0x15   :  { %204 = vmatpush.msra.mxu3 %v392_v19 }
  0x16   :  { %385 = vmatpush.xpose.msk.msra.mxu0 %vm29_vm0, %v22_v5  ;;  %421 = vmatpush.xpose.msk.msrb.mxu1 %vm29_vm0, %v417_v34 }
  0x17   :  { %205 = vmatpush.msra.mxu3 %v391_v26 }
  0x18   :  { %404 = vmatpush.xpose.msk.msra.mxu2 %vm29_vm0, %v394_v17 }
  0x19   :  { %294 = vmatpush.msrb.mxu3 %v418_v33 }
  0x1a   :  { %386 = vmatpush.xpose.msk.msra.mxu0 %vm29_vm0, %v21_v6  ;;  %422 = vmatpush.xpose.msk.msrb.mxu1 %vm29_vm0, %v416_v35 }
  0x1b   :  { %295 = vmatpush.msrb.mxu3 %v417_v34 }
  0x1c   :  { %405 = vmatpush.xpose.msk.msra.mxu2 %vm29_vm0, %v393_v18 }
  0x1d   :  { %296 = vmatpush.msrb.mxu3 %v416_v35 }
  0x1e   :  { %387 = vmatpush.xpose.msk.msra.mxu0 %vm29_vm0, %v20_v7  ;;  %423 = vmatpush.xpose.msk.msrb.mxu1 %vm29_vm0, %v415_v36 }
  0x1f   :  { %297 = vmatpush.msrb.mxu3 %v415_v36 }
  0x20   :  { %406 = vmatpush.xpose.msk.msra.mxu2 %vm29_vm0, %v392_v19 }
  0x21   :  { %388 = vmatmul.msk.f32.vlgmr.msra.gmra.mxu0 %vm29_vm0, %v583_v8  ;;  %298 = vmatpush.msrb.mxu3 %v414_v37 }
  0x22   :  { %424 = vmatpush.xpose.msk.msrb.mxu1 %vm29_vm0, %v414_v37 }
  0x23   :  { %299 = vmatpush.msrb.mxu3 %v413_v38 }
  0x24   :  { %407 = vmatpush.xpose.msk.msra.mxu2 %vm29_vm0, %v391_v26 }
  0x25   :  { %300 = vmatpush.msrb.mxu3 %v412_v39 }
  0x26   :  { %425 = vmatpush.xpose.msk.msrb.mxu1 %vm29_vm0, %v413_v38 }
  0x27   :  { %301 = vmatpush.msrb.mxu3 %v411_v43 }
  0x2a   :  { %426 = vmatpush.xpose.msk.msrb.mxu1 %vm29_vm0, %v412_v39 }
  0x2e   :  { %427 = vmatpush.xpose.msk.msrb.mxu1 %vm29_vm0, %v411_v43 }
  0x9e   :  { %v74_v10 = vpop.f32.mrf.mxu0 }
  0x9f   :  { %v80_v11 = vsub.f32 %v435_v9, %v74_v10 }
  0xa1   :  { %v82_v12 = vsel %vm81_vm1, %v80_v11, inf }
  0xa2   :  { %83 = vmin.index.xlane.f32.xlu0 %v82_v12 }
 0x115   :  { %v84_v22 = vpop.xlane.xlu0 %83 }
 0x116   :  { %vm87_vm3 = vcmp.eq.s32.totalorder %v619_v21, %v84_v22  ;;  %v113_v23 = vperm.slane %v84_v22, %v619_v21 }
 0x117   :  { %v389_v25 = vsel %vm87_vm3, 1.0, %v514_v24 }
 0x118   :  { %115 = vst.msk [vmem:[#allocation4] sm:$0x1] %vm114_vm2, %v113_v23  ;;  %390 = vmatmul.msk.f32.vlgmr.msra.gmra.mxu1 %vm81_vm1, %v389_v25 }
 0x195   :  { %v110_v27 = vpop.f32.mrf.mxu1 }
 0x196   :  { %v116_v28 = vsub.f32 %v583_v8, %v110_v27 }
 0x198   :  { %408 = vmatmul.msk.f32.vlgmr.msra.gmra.mxu2 %vm29_vm0, %v116_v28  ;;  %v117_v55 = vmul.f32 %v116_v28, %v116_v28 }
 0x21b   :  { %v174_v30 = vpop.f32.mrf.mxu2 }
 0x21c   :  { %v180_v31 = vsub.f32 %v436_v29, %v174_v30 }
 0x21e   :  { %v181_v32 = vsel %vm81_vm1, %v180_v31, inf }
 0x21f   :  { %182 = vmin.index.xlane.f32.xlu0 %v181_v32 }
 0x292   :  { %v183_v40 = vpop.xlane.xlu0 %182 }
 0x293   :  { %vm184_vm4 = vcmp.eq.s32.totalorder %v619_v21, %v183_v40  ;;  %v210_v41 = vperm.slane %v183_v40, %v619_v21 }
 0x294   :  { %v409_v42 = vsel %vm184_vm4, 1.0, %v514_v24 }
 0x295   :  { %211 = vst.msk [vmem:[#allocation4 + $0x1] sm:$0x1] %vm114_vm2, %v210_v41  ;;  %410 = vmatmul.msk.f32.vlgmr.msra.gmra.mxu3 %vm81_vm1, %v409_v42 }
 0x318   :  { %v207_v44 = vpop.f32.mrf.mxu3 }
 0x319   :  { %v212_v45 = vsub.f32 %v116_v28, %v207_v44 }
 0x31b   :  { %428 = vmatmul.msk.f32.vlgmr.msrb.gmra.mxu1 %vm29_vm0, %v212_v45  ;;  %v213_v53 = vmul.f32 %v212_v45, %v212_v45 }
 0x31d   :  { %v214_v59 = vadd.f32 %v213_v53, %v117_v55 }
 0x398   :  { %v270_v47 = vpop.f32.mrf.mxu1 }
 0x399   :  { %v276_v48 = vsub.f32 %v437_v46, %v270_v47 }
 0x39b   :  { %v277_v49 = vsel %vm81_vm1, %v276_v48, inf }
 0x39c   :  { %278 = vmin.index.xlane.f32.xlu1 %v277_v49 }
 0x40f   :  { %v279_v50 = vpop.xlane.xlu1 %278 }
 0x410   :  { %vm280_vm5 = vcmp.eq.s32.totalorder %v619_v21, %v279_v50  ;;  %v306_v51 = vperm.slane %v279_v50, %v619_v21 }
 0x411   :  { %v429_v52 = vsel %vm280_vm5, 1.0, %v514_v24 }
 0x412   :  { %307 = vst.msk [vmem:[#allocation4 + $0x2] sm:$0x1] %vm114_vm2, %v306_v51  ;;  %430 = vmatmul.msk.f32.vlgmr.msrb.gmra.mxu3 %vm81_vm1, %v429_v52 }
 0x413   :  { %354 = dma.vmem_to_hbm [thread:$0]  %s350_s24, 64, %s352_s22, [#allocation5]  }
 0x495   :  { %v303_v54 = vpop.f32.mrf.mxu3 }
 0x496   :  { %v308_v56 = vsub.f32 %v212_v45, %v303_v54 }
 0x498   :  { %v309_v57 = vmul.f32 %v308_v56, %v308_v56  ;;  %v312_v58 = vsub.f32 %v583_v8, %v308_v56 }
 0x49a   :  { %313 = vst.msk [vmem:[#allocation2] sm:$0xff] %vm29_vm0, %v312_v58  ;;  %v310_v60 = vadd.f32 %v309_v57, %v214_v59 }
 0x49b   :  { %343 = dma.vmem_to_hbm [thread:$0]  %s339_s26, 128, %s341_s29, [#allocation3]  }
 0x49c   :  { %v322_v61 = vsel %vm29_vm0, %v310_v60, 0.0 }
 0x49d   :  { %323 = vadd.xlane.f32.xlu1 %v322_v61 }
 0x510   :  { %v324_v62 = vpop.xlane.xlu1 %323 }
 0x511   :  { %v326_v63 = vrot.slane %v324_v62, 4 }
 0x513   :  { %v327_v0 = vadd.f32 %v326_v63, %v324_v62 }
 0x515   :  { %v328_v1 = vrot.slane %v327_v0, 2 }
 0x517   :  { %v329_v2 = vadd.f32 %v328_v1, %v327_v0 }
 0x519   :  { %v330_v3 = vrot.slane %v329_v2, 1 }
 0x51b   :  { %v331_v4 = vadd.f32 %v330_v3, %v329_v2 }
 0x51d   :  { %332 = vst [vmem:[#allocation6] sm:$0x1] %v331_v4 }
 0x51e   :  { %365 = dma.vmem_to_hbm [thread:$0]  %s361_s30, 16, %s363_s8, [#allocation5]  }
 0x51f   :  { %510 = dma.done.wait [#allocation3], 128  }
 0x520   :  { %511 = vsyncadd [#allocation3], 4294967168 }
 0x521   :  { %512 = dma.done.wait [#allocation5], 80  }
 0x522   :  { %513 = vsyncadd [#allocation5], 4294967216 }
 0x523   :  { %378 = vsyncpa [#allocation3], 1 }
 0x524   :  { %379 = vsyncpa [#allocation5], 1 }

</bundles_post_ra>
